<compile_context>
chip_gen: v7x
topology: tpu7x:2x2x1
jax: 0.10.0
libtpu: 0.0.40
codegen_flags: <defaults>
</compile_context>

<pallas_src>
import functools
import math

import jax
import jax.numpy as jnp
from jax.experimental import pallas as pl
from jax.experimental.pallas import tpu as pltpu


def _layer_dims(nsv_dim):
    return [nsv_dim, 32, 64, 128, 256, 128, 64, 32, nsv_dim]


def _round_up(n, m):
    return ((n + m - 1) // m) * m


def _nsv_mlp_kernel(x_ref,
                    w1, b1, w2, b2, w3, b3, w4, b4,
                    w5, b5, w6, b6, w7, b7, w8, b8,
                    o_ref, *, compute_dtype):
    h = x_ref[...]

    def dense(h, w_ref, b_ref, relu):
        # Cast only the matmul operands to the compute dtype (MXU benefits);
        # bias add / ReLU and accumulation stay in f32.
        y = jnp.dot(h.astype(compute_dtype), w_ref[...],
                    preferred_element_type=jnp.float32)
        y = y + b_ref[...].astype(jnp.float32)  # (1, out) broadcasts over rows
        return jnp.maximum(y, 0.0) if relu else y

    h = dense(h, w1, b1, True)
    h = dense(h, w2, b2, True)
    h = dense(h, w3, b3, True)
    h = dense(h, w4, b4, True)
    h = dense(h, w5, b5, True)
    h = dense(h, w6, b6, True)
    h = dense(h, w7, b7, True)
    y = dense(h, w8, b8, False)  # final layer: no ReLU
    o_ref[...] = y.astype(o_ref.dtype)


def init_params(key, nsv_dim):
    """Deterministic init mimicking PyTorch nn.Linear default U(+/- 1/sqrt(fan_in)).

    Returns a flat list [w1, b1, ..., w8, b8]; w_l is (in, out), b_l is (1, out).
    """
    dims = _layer_dims(nsv_dim)
    params = []
    for i in range(8):
        fan_in, fan_out = dims[i], dims[i + 1]
        key, kw, kb = jax.random.split(key, 3)
        bound = 1.0 / math.sqrt(fan_in)
        w = jax.random.uniform(kw, (fan_in, fan_out), jnp.float32, -bound, bound)
        b = jax.random.uniform(kb, (1, fan_out), jnp.float32, -bound, bound)
        params += [w, b]
    return params


def deeper_nsv_mlp(x, params, *, block_batch=2048, use_bf16=False):
    """x: (batch, nsv_dim) float32 -> (batch, nsv_dim) float32."""
    batch, nsv_dim = x.shape
    compute_dtype = jnp.bfloat16 if use_bf16 else jnp.float32

    if use_bf16:
        # Weights (even indices) to bf16 for MXU throughput; biases stay f32.
        params = [p.astype(jnp.bfloat16) if i % 2 == 0 else p
                  for i, p in enumerate(params)]

    # Batch tile: sublane-aligned (multiple of 8), never larger than the padded
    # batch, big enough to amortize per-grid-step overhead.
    tb = min(block_batch, _round_up(batch, 8))
    tb = _round_up(tb, 8)
    padded = _round_up(batch, tb)
    if padded != batch:
        x = jnp.pad(x, ((0, padded - batch), (0, 0)))

    grid = (pl.cdiv(padded, tb),)

    x_spec = pl.BlockSpec((tb, nsv_dim), lambda i: (i, 0))
    out_spec = pl.BlockSpec((tb, nsv_dim), lambda i: (i, 0))
    # Constant index_map -> each weight/bias block is fetched once and stays
    # resident in VMEM for every grid step.
    param_specs = [pl.BlockSpec(p.shape, lambda i: (0, 0)) for p in params]

    dims = _layer_dims(nsv_dim)
    flops = 2 * padded * sum(dims[i] * dims[i + 1] for i in range(8))
    param_bytes = sum(p.size * p.dtype.itemsize for p in params)
    bytes_accessed = 2 * padded * nsv_dim * 4 + param_bytes

    kernel = functools.partial(_nsv_mlp_kernel, compute_dtype=compute_dtype)

    out = pl.pallas_call(
        kernel,
        out_shape=jax.ShapeDtypeStruct((padded, nsv_dim), jnp.float32),
        grid=grid,
        in_specs=[x_spec] + param_specs,
        out_specs=out_spec,
        compiler_params=pltpu.CompilerParams(
            dimension_semantics=("parallel",),
            vmem_limit_bytes=32 * 1024 * 1024,
        ),
        cost_estimate=pl.CostEstimate(
            flops=flops, transcendentals=0, bytes_accessed=bytes_accessed),
    )(x, *params)

    return out[:batch]


def _reference(x, params):
    h = x
    for i in range(7):
        w, b = params[2 * i], params[2 * i + 1]
        h = jnp.maximum(h @ w + b, 0.0)
    w, b = params[14], params[15]
    return h @ w + b


if __name__ == "__main__":
    nsv_dim = 8
    key = jax.random.PRNGKey(0)
    key, kx1, kx2, kx3 = jax.random.split(key, 4)
    params = init_params(key, nsv_dim)

    # 1) Small shape consistent with the module: batch=2.
    x_small = jax.random.normal(kx1, (2, nsv_dim), jnp.float32)
    out_small = jax.block_until_ready(deeper_nsv_mlp(x_small, params))
    ref_small = _reference(x_small, params)
    assert out_small.shape == (2, nsv_dim)
    assert jnp.allclose(out_small, ref_small, atol=1e-4, rtol=1e-4), \
        "f32 small-batch mismatch vs reference"

    # 2) Exercise the batch grid (multiple tiles + uneven tail padding).
    x_big = jax.random.normal(kx2, (20, nsv_dim), jnp.float32)
    out_big = jax.block_until_ready(deeper_nsv_mlp(x_big, params, block_batch=8))
    ref_big = _reference(x_big, params)
    assert out_big.shape == (20, nsv_dim)
    assert jnp.allclose(out_big, ref_big, atol=1e-4, rtol=1e-4), \
        "f32 tiled-batch mismatch vs reference"

    # 3) bf16 fast path (f32 accumulation); validated with loose tolerance.
    out_bf16 = jax.block_until_ready(
        deeper_nsv_mlp(x_big, params, block_batch=8, use_bf16=True))
    assert out_bf16.shape == (20, nsv_dim)
    assert jnp.allclose(out_bf16, ref_big, atol=1e-1, rtol=1e-1), \
        "bf16 path mismatch vs reference (beyond loose tolerance)"

    # 4) Default (large) tile path: 2 grid steps of TB=2048, weights resident.
    x_huge = jax.random.normal(kx3, (4096, nsv_dim), jnp.float32)
    out_huge = jax.block_until_ready(deeper_nsv_mlp(x_huge, params))
    ref_huge = _reference(x_huge, params)
    assert out_huge.shape == (4096, nsv_dim)
    assert jnp.allclose(out_huge, ref_huge, atol=1e-3, rtol=1e-3), \
        "f32 large-tile mismatch vs reference"

    print("KERNEL_OK")
</pallas_src>

<mosaic_0001>
module attributes {stable_mosaic.version = 11 : i64} {
  func.func @_nsv_mlp_kernel(%arg0: i32, %arg1: memref<8x8xf32, #tpu.memory_space<vmem>>, %arg2: memref<8x32xf32, #tpu.memory_space<vmem>>, %arg3: memref<1x32xf32, #tpu.memory_space<vmem>>, %arg4: memref<32x64xf32, #tpu.memory_space<vmem>>, %arg5: memref<1x64xf32, #tpu.memory_space<vmem>>, %arg6: memref<64x128xf32, #tpu.memory_space<vmem>>, %arg7: memref<1x128xf32, #tpu.memory_space<vmem>>, %arg8: memref<128x256xf32, #tpu.memory_space<vmem>>, %arg9: memref<1x256xf32, #tpu.memory_space<vmem>>, %arg10: memref<256x128xf32, #tpu.memory_space<vmem>>, %arg11: memref<1x128xf32, #tpu.memory_space<vmem>>, %arg12: memref<128x64xf32, #tpu.memory_space<vmem>>, %arg13: memref<1x64xf32, #tpu.memory_space<vmem>>, %arg14: memref<64x32xf32, #tpu.memory_space<vmem>>, %arg15: memref<1x32xf32, #tpu.memory_space<vmem>>, %arg16: memref<32x8xf32, #tpu.memory_space<vmem>>, %arg17: memref<1x8xf32, #tpu.memory_space<vmem>>, %arg18: memref<8x8xf32, #tpu.memory_space<vmem>>) attributes {dimension_semantics = [#tpu.dimension_semantics<parallel>], iteration_bounds = array<i64: 1>, scalar_prefetch = 0 : i64, scratch_operands = 0 : i64, tpu.core_type = #tpu.core_type<tc>, window_params = [{transform_indices = @transform_0, window_bounds = array<i64: 8, 8>}, {pipeline_mode = #tpu.pipeline_mode<synchronous>, transform_indices = @transform_1, window_bounds = array<i64: 8, 32>}, {pipeline_mode = #tpu.pipeline_mode<synchronous>, transform_indices = @transform_2, window_bounds = array<i64: 1, 32>}, {pipeline_mode = #tpu.pipeline_mode<synchronous>, transform_indices = @transform_3, window_bounds = array<i64: 32, 64>}, {pipeline_mode = #tpu.pipeline_mode<synchronous>, transform_indices = @transform_4, window_bounds = array<i64: 1, 64>}, {pipeline_mode = #tpu.pipeline_mode<synchronous>, transform_indices = @transform_5, window_bounds = array<i64: 64, 128>}, {pipeline_mode = #tpu.pipeline_mode<synchronous>, transform_indices = @transform_6, window_bounds = array<i64: 1, 128>}, {pipeline_mode = #tpu.pipeline_mode<synchronous>, transform_indices = @transform_7, window_bounds = array<i64: 128, 256>}, {pipeline_mode = #tpu.pipeline_mode<synchronous>, transform_indices = @transform_8, window_bounds = array<i64: 1, 256>}, {pipeline_mode = #tpu.pipeline_mode<synchronous>, transform_indices = @transform_9, window_bounds = array<i64: 256, 128>}, {pipeline_mode = #tpu.pipeline_mode<synchronous>, transform_indices = @transform_10, window_bounds = array<i64: 1, 128>}, {pipeline_mode = #tpu.pipeline_mode<synchronous>, transform_indices = @transform_11, window_bounds = array<i64: 128, 64>}, {pipeline_mode = #tpu.pipeline_mode<synchronous>, transform_indices = @transform_12, window_bounds = array<i64: 1, 64>}, {pipeline_mode = #tpu.pipeline_mode<synchronous>, transform_indices = @transform_13, window_bounds = array<i64: 64, 32>}, {pipeline_mode = #tpu.pipeline_mode<synchronous>, transform_indices = @transform_14, window_bounds = array<i64: 1, 32>}, {pipeline_mode = #tpu.pipeline_mode<synchronous>, transform_indices = @transform_15, window_bounds = array<i64: 32, 8>}, {pipeline_mode = #tpu.pipeline_mode<synchronous>, transform_indices = @transform_16, window_bounds = array<i64: 1, 8>}, {transform_indices = @transform_17, window_bounds = array<i64: 8, 8>}]} {
    %c0 = arith.constant 0 : index
    %c0_0 = arith.constant 0 : index
    %0 = vector.load %arg1[%c0, %c0_0] : memref<8x8xf32, #tpu.memory_space<vmem>>, vector<8x8xf32>
    %c0_1 = arith.constant 0 : index
    %c0_2 = arith.constant 0 : index
    %1 = vector.load %arg2[%c0_1, %c0_2] : memref<8x32xf32, #tpu.memory_space<vmem>>, vector<8x32xf32>
    %cst = arith.constant dense<0.000000e+00> : vector<8x32xf32>
    %2 = tpu.matmul %0, %1, %cst {dimension_numbers = #tpu.dot_dimension_numbers<[1], [0], [0], [1], [0, 0, 1, 1], [], []>} : vector<8x8xf32>, vector<8x32xf32>, vector<8x32xf32> -> vector<8x32xf32>
    %c0_3 = arith.constant 0 : index
    %c0_4 = arith.constant 0 : index
    %3 = vector.load %arg3[%c0_3, %c0_4] : memref<1x32xf32, #tpu.memory_space<vmem>>, vector<1x32xf32>
    %4 = vector.broadcast %3 : vector<1x32xf32> to vector<8x32xf32>
    %5 = arith.addf %2, %4 : vector<8x32xf32>
    %cst_5 = arith.constant 0.000000e+00 : f32
    %6 = vector.broadcast %cst_5 : f32 to vector<8x32xf32>
    %7 = arith.maximumf %5, %6 : vector<8x32xf32>
    %c0_6 = arith.constant 0 : index
    %c0_7 = arith.constant 0 : index
    %8 = vector.load %arg4[%c0_6, %c0_7] : memref<32x64xf32, #tpu.memory_space<vmem>>, vector<32x64xf32>
    %cst_8 = arith.constant dense<0.000000e+00> : vector<8x64xf32>
    %9 = tpu.matmul %7, %8, %cst_8 {dimension_numbers = #tpu.dot_dimension_numbers<[1], [0], [0], [1], [0, 0, 1, 1], [], []>} : vector<8x32xf32>, vector<32x64xf32>, vector<8x64xf32> -> vector<8x64xf32>
    %c0_9 = arith.constant 0 : index
    %c0_10 = arith.constant 0 : index
    %10 = vector.load %arg5[%c0_9, %c0_10] : memref<1x64xf32, #tpu.memory_space<vmem>>, vector<1x64xf32>
    %11 = vector.broadcast %10 : vector<1x64xf32> to vector<8x64xf32>
    %12 = arith.addf %9, %11 : vector<8x64xf32>
    %cst_11 = arith.constant 0.000000e+00 : f32
    %13 = vector.broadcast %cst_11 : f32 to vector<8x64xf32>
    %14 = arith.maximumf %12, %13 : vector<8x64xf32>
    %c0_12 = arith.constant 0 : index
    %c0_13 = arith.constant 0 : index
    %15 = vector.load %arg6[%c0_12, %c0_13] : memref<64x128xf32, #tpu.memory_space<vmem>>, vector<64x128xf32>
    %cst_14 = arith.constant dense<0.000000e+00> : vector<8x128xf32>
    %16 = tpu.matmul %14, %15, %cst_14 {dimension_numbers = #tpu.dot_dimension_numbers<[1], [0], [0], [1], [0, 0, 1, 1], [], []>} : vector<8x64xf32>, vector<64x128xf32>, vector<8x128xf32> -> vector<8x128xf32>
    %c0_15 = arith.constant 0 : index
    %c0_16 = arith.constant 0 : index
    %17 = vector.load %arg7[%c0_15, %c0_16] : memref<1x128xf32, #tpu.memory_space<vmem>>, vector<1x128xf32>
    %18 = vector.broadcast %17 : vector<1x128xf32> to vector<8x128xf32>
    %19 = arith.addf %16, %18 : vector<8x128xf32>
    %cst_17 = arith.constant 0.000000e+00 : f32
    %20 = vector.broadcast %cst_17 : f32 to vector<8x128xf32>
    %21 = arith.maximumf %19, %20 : vector<8x128xf32>
    %c0_18 = arith.constant 0 : index
    %c0_19 = arith.constant 0 : index
    %22 = vector.load %arg8[%c0_18, %c0_19] : memref<128x256xf32, #tpu.memory_space<vmem>>, vector<128x256xf32>
    %cst_20 = arith.constant dense<0.000000e+00> : vector<8x256xf32>
    %23 = tpu.matmul %21, %22, %cst_20 {dimension_numbers = #tpu.dot_dimension_numbers<[1], [0], [0], [1], [0, 0, 1, 1], [], []>} : vector<8x128xf32>, vector<128x256xf32>, vector<8x256xf32> -> vector<8x256xf32>
    %c0_21 = arith.constant 0 : index
    %c0_22 = arith.constant 0 : index
    %24 = vector.load %arg9[%c0_21, %c0_22] : memref<1x256xf32, #tpu.memory_space<vmem>>, vector<1x256xf32>
    %25 = vector.broadcast %24 : vector<1x256xf32> to vector<8x256xf32>
    %26 = arith.addf %23, %25 : vector<8x256xf32>
    %cst_23 = arith.constant 0.000000e+00 : f32
    %27 = vector.broadcast %cst_23 : f32 to vector<8x256xf32>
    %28 = arith.maximumf %26, %27 : vector<8x256xf32>
    %c0_24 = arith.constant 0 : index
    %c0_25 = arith.constant 0 : index
    %29 = vector.load %arg10[%c0_24, %c0_25] : memref<256x128xf32, #tpu.memory_space<vmem>>, vector<256x128xf32>
    %cst_26 = arith.constant dense<0.000000e+00> : vector<8x128xf32>
    %30 = tpu.matmul %28, %29, %cst_26 {dimension_numbers = #tpu.dot_dimension_numbers<[1], [0], [0], [1], [0, 0, 1, 1], [], []>} : vector<8x256xf32>, vector<256x128xf32>, vector<8x128xf32> -> vector<8x128xf32>
    %c0_27 = arith.constant 0 : index
    %c0_28 = arith.constant 0 : index
    %31 = vector.load %arg11[%c0_27, %c0_28] : memref<1x128xf32, #tpu.memory_space<vmem>>, vector<1x128xf32>
    %32 = vector.broadcast %31 : vector<1x128xf32> to vector<8x128xf32>
    %33 = arith.addf %30, %32 : vector<8x128xf32>
    %cst_29 = arith.constant 0.000000e+00 : f32
    %34 = vector.broadcast %cst_29 : f32 to vector<8x128xf32>
    %35 = arith.maximumf %33, %34 : vector<8x128xf32>
    %c0_30 = arith.constant 0 : index
    %c0_31 = arith.constant 0 : index
    %36 = vector.load %arg12[%c0_30, %c0_31] : memref<128x64xf32, #tpu.memory_space<vmem>>, vector<128x64xf32>
    %cst_32 = arith.constant dense<0.000000e+00> : vector<8x64xf32>
    %37 = tpu.matmul %35, %36, %cst_32 {dimension_numbers = #tpu.dot_dimension_numbers<[1], [0], [0], [1], [0, 0, 1, 1], [], []>} : vector<8x128xf32>, vector<128x64xf32>, vector<8x64xf32> -> vector<8x64xf32>
    %c0_33 = arith.constant 0 : index
    %c0_34 = arith.constant 0 : index
    %38 = vector.load %arg13[%c0_33, %c0_34] : memref<1x64xf32, #tpu.memory_space<vmem>>, vector<1x64xf32>
    %39 = vector.broadcast %38 : vector<1x64xf32> to vector<8x64xf32>
    %40 = arith.addf %37, %39 : vector<8x64xf32>
    %cst_35 = arith.constant 0.000000e+00 : f32
    %41 = vector.broadcast %cst_35 : f32 to vector<8x64xf32>
    %42 = arith.maximumf %40, %41 : vector<8x64xf32>
    %c0_36 = arith.constant 0 : index
    %c0_37 = arith.constant 0 : index
    %43 = vector.load %arg14[%c0_36, %c0_37] : memref<64x32xf32, #tpu.memory_space<vmem>>, vector<64x32xf32>
    %cst_38 = arith.constant dense<0.000000e+00> : vector<8x32xf32>
    %44 = tpu.matmul %42, %43, %cst_38 {dimension_numbers = #tpu.dot_dimension_numbers<[1], [0], [0], [1], [0, 0, 1, 1], [], []>} : vector<8x64xf32>, vector<64x32xf32>, vector<8x32xf32> -> vector<8x32xf32>
    %c0_39 = arith.constant 0 : index
    %c0_40 = arith.constant 0 : index
    %45 = vector.load %arg15[%c0_39, %c0_40] : memref<1x32xf32, #tpu.memory_space<vmem>>, vector<1x32xf32>
    %46 = vector.broadcast %45 : vector<1x32xf32> to vector<8x32xf32>
    %47 = arith.addf %44, %46 : vector<8x32xf32>
    %cst_41 = arith.constant 0.000000e+00 : f32
    %48 = vector.broadcast %cst_41 : f32 to vector<8x32xf32>
    %49 = arith.maximumf %47, %48 : vector<8x32xf32>
    %c0_42 = arith.constant 0 : index
    %c0_43 = arith.constant 0 : index
    %50 = vector.load %arg16[%c0_42, %c0_43] : memref<32x8xf32, #tpu.memory_space<vmem>>, vector<32x8xf32>
    %cst_44 = arith.constant dense<0.000000e+00> : vector<8x8xf32>
    %51 = tpu.matmul %49, %50, %cst_44 {dimension_numbers = #tpu.dot_dimension_numbers<[1], [0], [0], [1], [0, 0, 1, 1], [], []>} : vector<8x32xf32>, vector<32x8xf32>, vector<8x8xf32> -> vector<8x8xf32>
    %c0_45 = arith.constant 0 : index
    %c0_46 = arith.constant 0 : index
    %52 = vector.load %arg17[%c0_45, %c0_46] : memref<1x8xf32, #tpu.memory_space<vmem>>, vector<1x8xf32>
    %53 = vector.broadcast %52 : vector<1x8xf32> to vector<8x8xf32>
    %54 = arith.addf %51, %53 : vector<8x8xf32>
    %c0_47 = arith.constant 0 : index
    %c0_48 = arith.constant 0 : index
    %55 = vector.load %arg18[%c0_47, %c0_48] : memref<8x8xf32, #tpu.memory_space<vmem>>, vector<8x8xf32>
    tpu.vector_store %arg18[%c0_47, %c0_48], %54 {strides = array<i32>} : memref<8x8xf32, #tpu.memory_space<vmem>>, vector<8x8xf32>,
    return
  }
  func.func @transform_0(%arg0: i32) -> (i32, i32) {
    %c0_i32 = arith.constant 0 : i32
    %c0_i32_0 = arith.constant 0 : i32
    return %arg0, %c0_i32 : i32, i32
  }
  func.func @transform_1(%arg0: i32) -> (i32, i32) {
    %c0_i32 = arith.constant 0 : i32
    %c0_i32_0 = arith.constant 0 : i32
    %c0_i32_1 = arith.constant 0 : i32
    return %c0_i32, %c0_i32_0 : i32, i32
  }
  func.func @transform_2(%arg0: i32) -> (i32, i32) {
    %c0_i32 = arith.constant 0 : i32
    %c0_i32_0 = arith.constant 0 : i32
    %c0_i32_1 = arith.constant 0 : i32
    return %c0_i32, %c0_i32_0 : i32, i32
  }
  func.func @transform_3(%arg0: i32) -> (i32, i32) {
    %c0_i32 = arith.constant 0 : i32
    %c0_i32_0 = arith.constant 0 : i32
    %c0_i32_1 = arith.constant 0 : i32
    return %c0_i32, %c0_i32_0 : i32, i32
  }
  func.func @transform_4(%arg0: i32) -> (i32, i32) {
    %c0_i32 = arith.constant 0 : i32
    %c0_i32_0 = arith.constant 0 : i32
    %c0_i32_1 = arith.constant 0 : i32
    return %c0_i32, %c0_i32_0 : i32, i32
  }
  func.func @transform_5(%arg0: i32) -> (i32, i32) {
    %c0_i32 = arith.constant 0 : i32
    %c0_i32_0 = arith.constant 0 : i32
    %c0_i32_1 = arith.constant 0 : i32
    return %c0_i32, %c0_i32_0 : i32, i32
  }
  func.func @transform_6(%arg0: i32) -> (i32, i32) {
    %c0_i32 = arith.constant 0 : i32
    %c0_i32_0 = arith.constant 0 : i32
    %c0_i32_1 = arith.constant 0 : i32
    return %c0_i32, %c0_i32_0 : i32, i32
  }
  func.func @transform_7(%arg0: i32) -> (i32, i32) {
    %c0_i32 = arith.constant 0 : i32
    %c0_i32_0 = arith.constant 0 : i32
    %c0_i32_1 = arith.constant 0 : i32
    return %c0_i32, %c0_i32_0 : i32, i32
  }
  func.func @transform_8(%arg0: i32) -> (i32, i32) {
    %c0_i32 = arith.constant 0 : i32
    %c0_i32_0 = arith.constant 0 : i32
    %c0_i32_1 = arith.constant 0 : i32
    return %c0_i32, %c0_i32_0 : i32, i32
  }
  func.func @transform_9(%arg0: i32) -> (i32, i32) {
    %c0_i32 = arith.constant 0 : i32
    %c0_i32_0 = arith.constant 0 : i32
    %c0_i32_1 = arith.constant 0 : i32
    return %c0_i32, %c0_i32_0 : i32, i32
  }
  func.func @transform_10(%arg0: i32) -> (i32, i32) {
    %c0_i32 = arith.constant 0 : i32
    %c0_i32_0 = arith.constant 0 : i32
    %c0_i32_1 = arith.constant 0 : i32
    return %c0_i32, %c0_i32_0 : i32, i32
  }
  func.func @transform_11(%arg0: i32) -> (i32, i32) {
    %c0_i32 = arith.constant 0 : i32
    %c0_i32_0 = arith.constant 0 : i32
    %c0_i32_1 = arith.constant 0 : i32
    return %c0_i32, %c0_i32_0 : i32, i32
  }
  func.func @transform_12(%arg0: i32) -> (i32, i32) {
    %c0_i32 = arith.constant 0 : i32
    %c0_i32_0 = arith.constant 0 : i32
    %c0_i32_1 = arith.constant 0 : i32
    return %c0_i32, %c0_i32_0 : i32, i32
  }
  func.func @transform_13(%arg0: i32) -> (i32, i32) {
    %c0_i32 = arith.constant 0 : i32
    %c0_i32_0 = arith.constant 0 : i32
    %c0_i32_1 = arith.constant 0 : i32
    return %c0_i32, %c0_i32_0 : i32, i32
  }
  func.func @transform_14(%arg0: i32) -> (i32, i32) {
    %c0_i32 = arith.constant 0 : i32
    %c0_i32_0 = arith.constant 0 : i32
    %c0_i32_1 = arith.constant 0 : i32
    return %c0_i32, %c0_i32_0 : i32, i32
  }
  func.func @transform_15(%arg0: i32) -> (i32, i32) {
    %c0_i32 = arith.constant 0 : i32
    %c0_i32_0 = arith.constant 0 : i32
    %c0_i32_1 = arith.constant 0 : i32
    return %c0_i32, %c0_i32_0 : i32, i32
  }
  func.func @transform_16(%arg0: i32) -> (i32, i32) {
    %c0_i32 = arith.constant 0 : i32
    %c0_i32_0 = arith.constant 0 : i32
    %c0_i32_1 = arith.constant 0 : i32
    return %c0_i32, %c0_i32_0 : i32, i32
  }
  func.func @transform_17(%arg0: i32) -> (i32, i32) {
    %c0_i32 = arith.constant 0 : i32
    %c0_i32_0 = arith.constant 0 : i32
    return %arg0, %c0_i32 : i32, i32
  }
}

</mosaic_0001>

<bundles_post_ra>
// kernel: tpu_custom_call.1
= control target key start
LH: loop header
LB: loop body
LE: loop exit
PB: predicated region body
PF: predicated region fallthrough
CT: control target
= control target key end

     0   :  { %s1928_s0 = inlined_call_operand.vmem [shape: f32[8,8], index: 0, kind: input, shape index: {}]   ;;  %s1929_s1 = inlined_call_operand.hbm [shape: f32[8,32], index: 1, kind: input, shape index: {}]   ;;  %s1930_s2 = inlined_call_operand.vmem [shape: f32[1,32], index: 2, kind: input, shape index: {}]   ;;  %s1931_s3 = inlined_call_operand.hbm [shape: f32[32,64], index: 3, kind: input, shape index: {}]   ;;  %s1932_s4 = inlined_call_operand.hbm [shape: f32[1,64], index: 4, kind: input, shape index: {}]   ;;  %s1933_s5 = inlined_call_operand.hbm [shape: f32[64,128], index: 5, kind: input, shape index: {}]   ;;  %s1934_s6 = inlined_call_operand.hbm [shape: f32[1,128], index: 6, kind: input, shape index: {}]   ;;  %s1935_s7 = inlined_call_operand.vmem [shape: f32[128,256], index: 7, kind: input, shape index: {}]   ;;  %s1936_s8 = inlined_call_operand.hbm [shape: f32[1,256], index: 8, kind: input, shape index: {}]   ;;  %s1937_s9 = inlined_call_operand.hbm [shape: f32[256,128], index: 9, kind: input, shape index: {}]   ;;  %s1938_s10 = inlined_call_operand.hbm [shape: f32[1,128], index: 10, kind: input, shape index: {}]   ;;  %s1939_s11 = inlined_call_operand.vmem [shape: f32[128,64], index: 11, kind: input, shape index: {}]   ;;  %s1940_s12 = inlined_call_operand.vmem [shape: f32[1,64], index: 12, kind: input, shape index: {}]   ;;  %s1941_s13 = inlined_call_operand.vmem [shape: f32[64,32], index: 13, kind: input, shape index: {}]   ;;  %s1942_s14 = inlined_call_operand.vmem [shape: f32[1,32], index: 14, kind: input, shape index: {}]   ;;  %s1943_s15 = inlined_call_operand.vmem [shape: f32[32,8], index: 15, kind: input, shape index: {}]   ;;  %s1944_s16 = inlined_call_operand.vmem [shape: f32[1,8], index: 16, kind: input, shape index: {}]   ;;  %s1945_s17 = inlined_call_operand.hbm [shape: f32[8,8], index: 17, kind: output, shape index: {}]  }
   0x1   :  { %1948 = sst [smem:[#allocation23_spill]] %s1928_s0 }
   0x2   :  { %1949 = sst [smem:[#allocation24_spill]] %s1929_s1 }
   0x3   :  { %1950 = sst [smem:[#allocation25_spill]] %s1945_s17 }
   0x4   :  { %22 = vsyncpa [#allocation3], 0 }
   0x5   :  { %23 = vsyncpa [#allocation6], 0 }
   0x6   :  { %24 = vsyncpa [#allocation9], 0 }
   0x7   :  { %25 = vsyncpa [#allocation12], 0 }
   0x8   :  { %26 = vsyncpa [#allocation15], 0 }
   0x9   :  { %27 = vsyncpa [#allocation4], 0  ;;  %s1472_s24 = smov [#allocation5]   ;;  %s1262_s28 = scalar_lea.hbm %s1931_s3, 512 }
   0xa   :  { %s47_s25 = sshll.u32 %s1472_s24, 4  ;;  %p1263_p0 = scmp.ne.s32.totalorder %s1931_s3, %s1262_s28  ;;  %s48_s25 = int_to_ptr.vmem [resolvable:$true] %s47_s25 }
   0xb   :  { %p1266_p1 = scmp.lt.u32.totalorder %s1262_s28, %s1931_s3 }
   0xd   :  { %p1268_p2 = pnand %p1266_p1, %p1263_p0 }
   0xf   :  { %1271 = shalt.err (!%p1268_p2)
}
  0x10   :  { %s1272_s19 = scalar_lea.vmem %s48_s25, 512  ;;  %p1277_p4 = scmp.lt.s32.totalorder %s48_s25, %s48_s25 }
  0x11   :  { %p1273_p3 = scmp.ne.s32.totalorder %s48_s25, %s1272_s19  ;;  %p1278_p5 = scmp.lt.s32.totalorder %s1272_s19, %s1272_s19 }
  0x13   :  { %p1279_p6 = por %p1278_p5, %p1277_p4 }
  0x15   :  { %p1280_p7 = pnand %p1279_p6, %p1273_p3 }
  0x17   :  { %1283 = shalt.err (!%p1280_p7)
}
  0x18   :  { %s1473_s1 = smov 128   ;;  %s1474_s20 = smov 8  }
  0x19   :  { %53 = dma.hbm_to_vmem [thread:$0]  %s1931_s3, 512, %s48_s25, [#allocation6], %s1473_s1, %s1473_s1, %s1474_s20  }
  0x1a   :  { %s1475_s23 = smov [#allocation8]   ;;  %s1476_s26 = smov [#allocation11]  }
  0x1b   :  { %s69_s24 = sshll.u32 %s1475_s23, 4  ;;  %s94_s27 = sshll.u32 %s1476_s26, 4  ;;  %s70_s24 = int_to_ptr.vmem [resolvable:$true] %s69_s24  ;;  %s95_s27 = int_to_ptr.vmem [resolvable:$true] %s94_s27 }
  0x1c   :  { %s1284_s0 = scalar_lea.hbm %s1933_s5, 1024 }
  0x1d   :  { %p1285_p8 = scmp.ne.s32.totalorder %s1933_s5, %s1284_s0  ;;  %p1288_p9 = scmp.lt.u32.totalorder %s1284_s0, %s1933_s5 }
  0x1f   :  { %p1290_p10 = pnand %p1288_p9, %p1285_p8 }
  0x21   :  { %1293 = shalt.err (!%p1290_p10)
}
  0x22   :  { %s1294_s3 = scalar_lea.vmem %s70_s24, 1024  ;;  %p1299_p12 = scmp.lt.s32.totalorder %s70_s24, %s70_s24 }
  0x23   :  { %p1295_p11 = scmp.ne.s32.totalorder %s70_s24, %s1294_s3  ;;  %p1300_p13 = scmp.lt.s32.totalorder %s1294_s3, %s1294_s3 }
  0x25   :  { %p1301_p0 = por %p1300_p13, %p1299_p12 }
  0x27   :  { %p1302_p1 = pnand %p1301_p0, %p1295_p11 }
  0x29   :  { %1305 = shalt.err (!%p1302_p1)
}
  0x2a   :  { %75 = dma.hbm_to_vmem [thread:$0]  %s1933_s5, 1024, %s70_s24, [#allocation9], %s1473_s1, %s1473_s1, %s1474_s20  }
  0x2b   :  { %s1306_s23 = scalar_lea.hbm %s1936_s8, 32 }
  0x2c   :  { %p1307_p2 = scmp.ne.s32.totalorder %s1936_s8, %s1306_s23  ;;  %p1310_p3 = scmp.lt.u32.totalorder %s1306_s23, %s1936_s8 }
  0x2e   :  { %p1312_p4 = pnand %p1310_p3, %p1307_p2 }
  0x30   :  { %1315 = shalt.err (!%p1312_p4)
}
  0x31   :  { %s1316_s30 = scalar_lea.vmem %s95_s27, 32  ;;  %p1321_p6 = scmp.lt.s32.totalorder %s95_s27, %s95_s27 }
  0x32   :  { %p1317_p5 = scmp.ne.s32.totalorder %s95_s27, %s1316_s30  ;;  %p1322_p7 = scmp.lt.s32.totalorder %s1316_s30, %s1316_s30 }
  0x34   :  { %p1323_p8 = por %p1322_p7, %p1321_p6 }
  0x36   :  { %p1324_p9 = pnand %p1323_p8, %p1317_p5 }
  0x38   :  { %1327 = shalt.err (!%p1324_p9)
}
  0x39   :  { %97 = dma.hbm_to_vmem [thread:$0]  %s1936_s8, 32, %s95_s27, [#allocation12]  }
  0x3a   :  { %s1477_s18 = smov [#allocation2]   ;;  %s1478_s3 = smov [#allocation7]  }
  0x3b   :  { %s36_s19 = sshll.u32 %s1477_s18, 4  ;;  %s60_s25 = sshll.u32 %s1478_s3, 4  ;;  %s37_s19 = int_to_ptr.vmem [resolvable:$true] %s36_s19  ;;  %s61_s25 = int_to_ptr.vmem [resolvable:$true] %s60_s25 }
  0x3c   :  { %s1951_s17 = sld [smem:[#allocation24_spill]] }
  0x42   :  { %s1328_s23 = scalar_lea.hbm %s1951_s17, 128 }
  0x43   :  { %p1329_p10 = scmp.ne.s32.totalorder %s1951_s17, %s1328_s23  ;;  %p1332_p11 = scmp.lt.u32.totalorder %s1328_s23, %s1951_s17 }
  0x45   :  { %p1334_p12 = pnand %p1332_p11, %p1329_p10 }
  0x47   :  { %1337 = shalt.err (!%p1334_p12)
}
  0x48   :  { %s1338_s8 = scalar_lea.vmem %s37_s19, 128  ;;  %p1343_p0 = scmp.lt.s32.totalorder %s37_s19, %s37_s19 }
  0x49   :  { %p1339_p13 = scmp.ne.s32.totalorder %s37_s19, %s1338_s8  ;;  %p1344_p1 = scmp.lt.s32.totalorder %s1338_s8, %s1338_s8 }
  0x4b   :  { %p1345_p2 = por %p1344_p1, %p1343_p0 }
  0x4d   :  { %p1346_p3 = pnand %p1345_p2, %p1339_p13 }
  0x4f   :  { %1349 = shalt.err (!%p1346_p3)
}
  0x50   :  { %39 = dma.hbm_to_vmem [thread:$0]  %s1951_s17, 128, %s37_s19, [#allocation3]  }
  0x51   :  { %s1350_s18 = scalar_lea.hbm %s1932_s4, 16 }
  0x52   :  { %p1351_p4 = scmp.ne.s32.totalorder %s1932_s4, %s1350_s18  ;;  %p1354_p5 = scmp.lt.u32.totalorder %s1350_s18, %s1932_s4 }
  0x54   :  { %p1356_p6 = pnand %p1354_p5, %p1351_p4 }
  0x56   :  { %1359 = shalt.err (!%p1356_p6)
}
  0x57   :  { %s1360_s26 = scalar_lea.vmem %s61_s25, 16  ;;  %s1364_s28 = scalar_lea.vmem %s61_s25, 32 }
  0x58   :  { %p1361_p7 = scmp.ne.s32.totalorder %s61_s25, %s1360_s26  ;;  %p1365_p8 = scmp.lt.s32.totalorder %s61_s25, %s61_s25 }
  0x59   :  { %p1366_p9 = scmp.lt.s32.totalorder %s1364_s28, %s1360_s26 }
  0x5b   :  { %p1367_p10 = por %p1366_p9, %p1365_p8 }
  0x5d   :  { %p1368_p11 = pnand %p1367_p10, %p1361_p7 }
  0x5f   :  { %1371 = shalt.err (!%p1368_p11)
}
  0x60   :  { %63 = dma.hbm_to_vmem [thread:$0]  %s1932_s4, 16, %s61_s25, [#allocation6]  }
  0x61   :  { %s1479_s29 = smov [#allocation10]   ;;  %s1480_s8 = smov [#allocation13]  }
  0x62   :  { %s82_s0 = sshll.u32 %s1479_s29, 4  ;;  %s103_s27 = sshll.u32 %s1480_s8, 4  ;;  %s83_s0 = int_to_ptr.vmem [resolvable:$true] %s82_s0  ;;  %s104_s27 = int_to_ptr.vmem [resolvable:$true] %s103_s27 }
  0x63   :  { %s1372_s24 = scalar_lea.hbm %s1934_s6, 16 }
  0x64   :  { %p1373_p12 = scmp.ne.s32.totalorder %s1934_s6, %s1372_s24  ;;  %p1376_p13 = scmp.lt.u32.totalorder %s1372_s24, %s1934_s6 }
  0x66   :  { %p1378_p0 = pnand %p1376_p13, %p1373_p12 }
  0x68   :  { %1381 = shalt.err (!%p1378_p0)
}
  0x69   :  { %s1382_s4 = scalar_lea.vmem %s83_s0, 16  ;;  %s1386_s25 = scalar_lea.vmem %s83_s0, 32 }
  0x6a   :  { %p1383_p1 = scmp.ne.s32.totalorder %s83_s0, %s1382_s4  ;;  %p1387_p2 = scmp.lt.s32.totalorder %s83_s0, %s83_s0 }
  0x6b   :  { %p1388_p3 = scmp.lt.s32.totalorder %s1386_s25, %s1382_s4 }
  0x6d   :  { %p1389_p4 = por %p1388_p3, %p1387_p2 }
  0x6f   :  { %p1390_p5 = pnand %p1389_p4, %p1383_p1 }
  0x71   :  { %1393 = shalt.err (!%p1390_p5)
}
  0x72   :  { %85 = dma.hbm_to_vmem [thread:$0]  %s1934_s6, 16, %s83_s0, [#allocation9]  }
  0x73   :  { %s1394_s17 = scalar_lea.hbm %s1937_s9, 4096 }
  0x74   :  { %p1395_p6 = scmp.ne.s32.totalorder %s1937_s9, %s1394_s17  ;;  %p1398_p7 = scmp.lt.u32.totalorder %s1394_s17, %s1937_s9 }
  0x76   :  { %p1400_p8 = pnand %p1398_p7, %p1395_p6 }
  0x78   :  { %1403 = shalt.err (!%p1400_p8)
}
  0x79   :  { %s1404_s24 = scalar_lea.vmem %s104_s27, 4096  ;;  %p1409_p10 = scmp.lt.s32.totalorder %s104_s27, %s104_s27 }
  0x7a   :  { %p1405_p9 = scmp.ne.s32.totalorder %s104_s27, %s1404_s24  ;;  %p1410_p11 = scmp.lt.s32.totalorder %s1404_s24, %s1404_s24 }
  0x7c   :  { %p1411_p12 = por %p1410_p11, %p1409_p10 }
  0x7e   :  { %p1412_p13 = pnand %p1411_p12, %p1405_p9 }
  0x80   :  { %1415 = shalt.err (!%p1412_p13)
}
  0x81   :  { %109 = dma.hbm_to_vmem [thread:$0]  %s1937_s9, 4096, %s104_s27, [#allocation12], %s1473_s1, %s1473_s1, %s1474_s20  }
  0x82   :  { %s1481_s18 = smov [#allocation14]   ;;  %s1416_s4 = scalar_lea.hbm %s1938_s10, 16 }
  0x83   :  { %s116_s3 = sshll.u32 %s1481_s18, 4  ;;  %p1417_p0 = scmp.ne.s32.totalorder %s1938_s10, %s1416_s4  ;;  %s117_s3 = int_to_ptr.vmem [resolvable:$true] %s116_s3 }
  0x84   :  { %p1420_p1 = scmp.lt.u32.totalorder %s1416_s4, %s1938_s10 }
  0x86   :  { %p1422_p2 = pnand %p1420_p1, %p1417_p0 }
  0x88   :  { %1425 = shalt.err (!%p1422_p2)
}
  0x89   :  { %s1426_s19 = scalar_lea.vmem %s117_s3, 16  ;;  %s1430_s9 = scalar_lea.vmem %s117_s3, 32 }
  0x8a   :  { %p1427_p3 = scmp.ne.s32.totalorder %s117_s3, %s1426_s19  ;;  %p1431_p4 = scmp.lt.s32.totalorder %s117_s3, %s117_s3 }
  0x8b   :  { %p1432_p5 = scmp.lt.s32.totalorder %s1430_s9, %s1426_s19 }
  0x8d   :  { %p1433_p6 = por %p1432_p5, %p1431_p4 }
  0x8f   :  { %p1434_p7 = pnand %p1433_p6, %p1427_p3 }
  0x91   :  { %1437 = shalt.err (!%p1434_p7)
}
  0x92   :  { %119 = dma.hbm_to_vmem [thread:$0]  %s1938_s10, 16, %s117_s3, [#allocation15]  }
  0x93   :  { %1460 = dma.done.wait [#allocation3], 128  }
  0x94   :  { %1461 = vsyncadd [#allocation3], 4294967168 }
  0x95   :  { %1462 = dma.done.wait [#allocation6], 528  }
  0x96   :  { %1463 = vsyncadd [#allocation6], 4294966768 }
  0x97   :  { %1464 = dma.done.wait [#allocation9], 1040  }
  0x98   :  { %1465 = vsyncadd [#allocation9], 4294966256 }
  0x99   :  { %1466 = dma.done.wait [#allocation12], 4128  }
  0x9a   :  { %1467 = vsyncadd [#allocation12], 4294963168 }
  0x9b   :  { %1468 = dma.done.wait [#allocation15], 16  }
  0x9c   :  { %1469 = vsyncadd [#allocation15], 4294967280  ;;  %v1482_v0 = vmov 0.0   ;;  %vm1483_vm0 = vmmov 0   ;;  %v1484_v1 = vmov 0.0|0.0   ;;  %vm165_vm1 = vcmask 64512  }
  0x9d   :  { %1024 = vmatprep.subr.mxu0 %v1482_v0  ;;  %1026 = vmatprep.mubr.msk.f32.mxu0 %vm1483_vm0, %v1482_v0  ;;  %v157_v2 = vld [vmem:[#allocation2] sm:$0xff]  ;;  %s1952_s17 = sld [smem:[#allocation23_spill]]  ;;  %v240_v4 = vld [vmem:[#allocation5] sm:$0xff]  ;;  %v241_v5 = vld [vmem:[#allocation5 + $0x8] sm:$0xff]  ;;  %vm251_vm2 = vcmask 261120   ;;  %vm341_vm3 = vcmask 523264  }
  0x9e   :  { %1124 = vmatprep.subr.bf16.mxu1 %v1484_v1  ;;  %1037 = vmatprep.mubr.msk.f32.mxu1 %vm1483_vm0, %v1482_v0  ;;  %v1125_v6 = vpack.c.bf16 %v241_v5, %v240_v4  ;;  %v242_v7 = vld [vmem:[#allocation5 + $0x10] sm:$0xff]  ;;  %v243_v8 = vld [vmem:[#allocation5 + $0x18] sm:$0xff]  ;;  %v326_v10 = vld [vmem:[#allocation8] sm:$0xff]  ;;  %s1485_s30 = smov [#allocation16]  }
  0x9f   :  { %1025 = vmatpush3.msra.mxu0 %v157_v2  ;;  %v1128_v9 = vpack.c.bf16 %v243_v8, %v242_v7  ;;  %v327_v11 = vld [vmem:[#allocation8 + $0x8] sm:$0xff]  ;;  %v328_v12 = vld [vmem:[#allocation8 + $0x10] sm:$0xff]  ;;  %v329_v14 = vld [vmem:[#allocation8 + $0x18] sm:$0xff]  ;;  %s917_s5 = sshll.u32 %s1485_s30, 4  ;;  %s918_s5 = int_to_ptr.vmem [resolvable:$true] %s917_s5 }
  0xa0   :  { %1130 = vmatprep.subr.bf16.mxu0 %v1484_v1  ;;  %1126 = vmatpush3.bf16.msra.mxu1 %v1125_v6  ;;  %v1131_v13 = vpack.c.bf16 %v327_v11, %v326_v10  ;;  %v1134_v15 = vpack.c.bf16 %v329_v14, %v328_v12  ;;  %v330_v16 = vld [vmem:[#allocation8 + $0x20] sm:$0xff]  ;;  %v331_v17 = vld [vmem:[#allocation8 + $0x28] sm:$0xff]  ;;  %v930_v19 = vld [vmem:[%s1930_s2] ss:$0 sm:$0xff]  ;;  %p1443_p9 = scmp.lt.s32.totalorder %s918_s5, %s918_s5 }
  0xa1   :  { %1127 = vmatprep.subr.bf16.mxu1 %v1484_v1  ;;  %v1137_v18 = vpack.c.bf16 %v331_v17, %v330_v16  ;;  %v332_v24 = vld [vmem:[#allocation8 + $0x30] sm:$0xff]  ;;  %v333_v25 = vld [vmem:[#allocation8 + $0x38] sm:$0xff]  ;;  %v418_v31 = vld [vmem:[%s1935_s7 + $0x10] sm:$0xff] }
  0xa2   :  { %v1140_v26 = vpack.c.bf16 %v333_v25, %v332_v24  ;;  %v417_v27 = vld [vmem:[%s1935_s7 + $0x8] sm:$0xff]  ;;  %v419_v28 = vld [vmem:[%s1935_s7 + $0x18] sm:$0xff]  ;;  %v416_v29 = vld [vmem:[%s1935_s7] sm:$0xff] }
  0xa3   :  { %v156_v3 = vld [vmem:[%s1952_s17] sm:$0xff]  ;;  %v1142_v30 = vpack.c.bf16 %v419_v28, %v417_v27  ;;  %v421_v32 = vld [vmem:[%s1935_s7 + $0x28] sm:$0xff]  ;;  %v423_v33 = vld [vmem:[%s1935_s7 + $0x38] sm:$0xff]  ;;  %v1144_v34 = vpack.c.bf16 %v418_v31, %v416_v29 }
  0xa4   :  { %1027 = vmatmul.mubr.msk.f32.vlgmr.msra.gmra.mrb[0].mxu0 %vm165_vm1, %v156_v3  ;;  %1129 = vmatpush3.bf16.msra.mxu1 %v1128_v9  ;;  %v1146_v35 = vpack.c.bf16 %v423_v33, %v421_v32  ;;  %v420_v36 = vld [vmem:[%s1935_s7 + $0x20] sm:$0xff]  ;;  %v422_v37 = vld [vmem:[%s1935_s7 + $0x30] sm:$0xff]  ;;  %v425_v38 = vld [vmem:[%s1935_s7 + $0x48] sm:$0xff] }
  0xa5   :  { %1056 = vmatprep.mubr.msk.f32.mxu0 %vm1483_vm0, %v1482_v0  ;;  %1132 = vmatpush3.bf16.msra.mxu0 %v1131_v13  ;;  %v427_v39 = vld [vmem:[%s1935_s7 + $0x58] sm:$0xff]  ;;  %v1148_v40 = vpack.c.bf16 %v422_v37, %v420_v36  ;;  %v424_v42 = vld [vmem:[%s1935_s7 + $0x40] sm:$0xff]  ;;  %v426_v43 = vld [vmem:[%s1935_s7 + $0x50] sm:$0xff] }
  0xa6   :  { %1133 = vmatprep.subr.bf16.mxu0 %v1484_v1  ;;  %1143 = vmatprep.subr.bf16.mxu1 %v1142_v30  ;;  %v1150_v41 = vpack.c.bf16 %v427_v39, %v425_v38  ;;  %v429_v44 = vld [vmem:[%s1935_s7 + $0x68] sm:$0xff]  ;;  %v431_v45 = vld [vmem:[%s1935_s7 + $0x78] sm:$0xff]  ;;  %v1152_v46 = vpack.c.bf16 %v426_v43, %v424_v42  ;;  %v428_v48 = vld [vmem:[%s1935_s7 + $0x60] sm:$0xff] }
  0xa7   :  { %v1154_v47 = vpack.c.bf16 %v431_v45, %v429_v44  ;;  %v430_v49 = vld [vmem:[%s1935_s7 + $0x70] sm:$0xff]  ;;  %v433_v50 = vld [vmem:[%s1935_s7 + $0x88] sm:$0xff]  ;;  %v435_v51 = vld [vmem:[%s1935_s7 + $0x98] sm:$0xff] }
  0xa8   :  { %v1156_v52 = vpack.c.bf16 %v430_v49, %v428_v48  ;;  %v1158_v53 = vpack.c.bf16 %v435_v51, %v433_v50  ;;  %v432_v54 = vld [vmem:[%s1935_s7 + $0x80] sm:$0xff]  ;;  %v434_v55 = vld [vmem:[%s1935_s7 + $0x90] sm:$0xff]  ;;  %v437_v56 = vld [vmem:[%s1935_s7 + $0xa8] sm:$0xff] }
  0xa9   :  { %1135 = vmatpush3.bf16.msra.mxu0 %v1134_v15  ;;  %v439_v57 = vld [vmem:[%s1935_s7 + $0xb8] sm:$0xff]  ;;  %v1160_v58 = vpack.c.bf16 %v434_v55, %v432_v54  ;;  %v436_v60 = vld [vmem:[%s1935_s7 + $0xa0] sm:$0xff]  ;;  %v438_v61 = vld [vmem:[%s1935_s7 + $0xb0] sm:$0xff] }
  0xaa   :  { %1136 = vmatprep.subr.bf16.mxu0 %v1484_v1  ;;  %v1162_v59 = vpack.c.bf16 %v439_v57, %v437_v56  ;;  %v441_v62 = vld [vmem:[%s1935_s7 + $0xc8] sm:$0xff]  ;;  %v443_v63 = vld [vmem:[%s1935_s7 + $0xd8] sm:$0xff]  ;;  %v1164_v2 = vpack.c.bf16 %v438_v61, %v436_v60  ;;  %v440_v4 = vld [vmem:[%s1935_s7 + $0xc0] sm:$0xff] }
  0xab   :  { %v1166_v3 = vpack.c.bf16 %v443_v63, %v441_v62  ;;  %v442_v5 = vld [vmem:[%s1935_s7 + $0xd0] sm:$0xff]  ;;  %v932_v7 = vld [vmem:[#allocation7] ss:$0 sm:$0xff]  ;;  %v447_v13 = vld [vmem:[%s1935_s7 + $0xf8] sm:$0xff] }
  0xac   :  { %v1168_v6 = vpack.c.bf16 %v442_v5, %v440_v4  ;;  %v445_v12 = vld [vmem:[%s1935_s7 + $0xe8] sm:$0xff]  ;;  %v444_v15 = vld [vmem:[%s1935_s7 + $0xe0] sm:$0xff]  ;;  %v446_v16 = vld [vmem:[%s1935_s7 + $0xf0] sm:$0xff] }
  0xad   :  { %1138 = vmatpush3.bf16.msra.mxu0 %v1137_v18  ;;  %v1170_v14 = vpack.c.bf16 %v447_v13, %v445_v12  ;;  %v1172_v17 = vpack.c.bf16 %v446_v16, %v444_v15  ;;  %v549_v18 = vld [vmem:[#allocation13 + $0x80] sm:$0xff]  ;;  %v552_v24 = vld [vmem:[#allocation13 + $0x98] sm:$0xff]  ;;  %v535_v27 = vld [vmem:[#allocation13 + $0x10] sm:$0xff] }
  0xae   :  { %1139 = vmatprep.subr.bf16.mxu0 %v1484_v1  ;;  %v536_v28 = vld [vmem:[#allocation13 + $0x18] sm:$0xff]  ;;  %v553_v29 = vld [vmem:[#allocation13 + $0xa0] sm:$0xff]  ;;  %v554_v30 = vld [vmem:[#allocation13 + $0xa8] sm:$0xff] }
  0xaf   :  { %v1180_v31 = vpack.c.bf16 %v536_v28, %v535_v27  ;;  %v1182_v32 = vpack.c.bf16 %v554_v30, %v553_v29  ;;  %v537_v33 = vld [vmem:[#allocation13 + $0x20] sm:$0xff]  ;;  %v556_v36 = vld [vmem:[#allocation13 + $0xb8] sm:$0xff]  ;;  %v539_v39 = vld [vmem:[#allocation13 + $0x30] sm:$0xff]  ;;  %v450_v27 = vlaneseq }
  0xb0   :  { %v558_v42 = vld [vmem:[#allocation13 + $0xc8] sm:$0xff]  ;;  %v541_v45 = vld [vmem:[#allocation13 + $0x40] sm:$0xff]  ;;  %v560_v48 = vld [vmem:[#allocation13 + $0xd8] sm:$0xff] }
  0xb1   :  { %1141 = vmatpush3.bf16.msra.mxu0 %v1140_v26  ;;  %v543_v51 = vld [vmem:[#allocation13 + $0x50] sm:$0xff]  ;;  %v562_v54 = vld [vmem:[#allocation13 + $0xe8] sm:$0xff]  ;;  %v934_v57 = vld [vmem:[#allocation10] ss:$0 sm:$0xff]  ;;  %v451_v28 = vshrl.u32 %v450_v27, 7 }
  0xb2   :  { %v545_v62 = vld [vmem:[#allocation13 + $0x60] sm:$0xff]  ;;  %v546_v63 = vld [vmem:[#allocation13 + $0x68] sm:$0xff]  ;;  %v564_v4 = vld [vmem:[#allocation13 + $0xf8] sm:$0xff] }
  0xb3   :  { %v646_v13 = vld [vmem:[%s1939_s11 + $0x18] sm:$0xff]  ;;  %v647_v15 = vld [vmem:[%s1939_s11 + $0x20] sm:$0xff]  ;;  %v648_v16 = vld [vmem:[%s1939_s11 + $0x28] sm:$0xff]  ;;  %v452_v29 = vsub.s32 0, %v451_v28 }
  0xb4   :  { %v448_v30 = vld [vmem:[#allocation11] sm:$0x3] }
 0x177   :  { %v235_v20 = vpop.f32.mrb[0].mxu0 }
 0x178   :  { %v236_v21 = vadd.f32 %v930_v19, %v235_v20  ;;  %v1028_v22 = vpop.f32.mrb[1].mxu0  ;;  %v550_v19 = vld [vmem:[#allocation13 + $0x88] sm:$0xff]  ;;  %v533_v20 = vld [vmem:[#allocation13] sm:$0xff] }
 0x179   :  { %v534_v22 = vld [vmem:[#allocation13 + $0x8] sm:$0xff] }
 0x17a   :  { %v239_v23 = vmax.f32 %v236_v21, 0.0  ;;  %v1174_v21 = vpack.c.bf16 %v550_v19, %v549_v18  ;;  %v1176_v25 = vpack.c.bf16 %v534_v22, %v533_v20  ;;  %v649_v18 = vld [vmem:[%s1939_s11 + $0x30] sm:$0xff]  ;;  %v650_v19 = vld [vmem:[%s1939_s11 + $0x38] sm:$0xff]  ;;  %v652_v22 = vld [vmem:[%s1939_s11 + $0x48] sm:$0xff] }
 0x17b   :  { %v1216_v20 = vpack.c.bf16 %v650_v19, %v649_v18 }
 0x17c   :  { %1038 = vmatmul.mubr.msk.f32.vlgmr.msra.gmra.mrb[0].mxu1 %vm251_vm2, %v239_v23  ;;  %v551_v23 = vld [vmem:[#allocation13 + $0x90] sm:$0xff]  ;;  %1175 = vmatprep.subr.bf16.mxu0 %v1174_v21 }
 0x17d   :  { %524 = vmatprep.mubr.f32.mxu1 %v1482_v0  ;;  %1145 = vmatpush1.bf16.msra.mxu1 %v1144_v34  ;;  %v1178_v26 = vpack.c.bf16 %v552_v24, %v551_v23  ;;  %v538_v34 = vld [vmem:[#allocation13 + $0x28] sm:$0xff]  ;;  %v651_v21 = vld [vmem:[%s1939_s11 + $0x40] sm:$0xff] }
 0x17e   :  { %1147 = vmatprep.subr.bf16.mxu1 %v1146_v35  ;;  %v555_v35 = vld [vmem:[#allocation13 + $0xb0] sm:$0xff]  ;;  %v1184_v37 = vpack.c.bf16 %v538_v34, %v537_v33  ;;  %v1219_v23 = vpack.c.bf16 %v652_v22, %v651_v21  ;;  %v653_v24 = vld [vmem:[%s1939_s11 + $0x50] sm:$0xff] }
 0x17f   :  { %v1186_v38 = vpack.c.bf16 %v556_v36, %v555_v35 }
 0x181   :  { %1149 = vmatpush1.bf16.msra.mxu1 %v1148_v40  ;;  %v540_v40 = vld [vmem:[#allocation13 + $0x38] sm:$0xff] }
 0x182   :  { %1151 = vmatprep.subr.bf16.mxu1 %v1150_v41  ;;  %v557_v41 = vld [vmem:[#allocation13 + $0xc0] sm:$0xff]  ;;  %v1188_v43 = vpack.c.bf16 %v540_v40, %v539_v39  ;;  %v655_v40 = vld [vmem:[%s1939_s11 + $0x60] sm:$0xff] }
 0x183   :  { %v1190_v44 = vpack.c.bf16 %v558_v42, %v557_v41  ;;  %v656_v41 = vld [vmem:[%s1939_s11 + $0x68] sm:$0xff] }
 0x184   :  { %v1225_v42 = vpack.c.bf16 %v656_v41, %v655_v40 }
 0x185   :  { %1153 = vmatpush1.bf16.msra.mxu1 %v1152_v46  ;;  %v542_v46 = vld [vmem:[#allocation13 + $0x48] sm:$0xff] }
 0x186   :  { %1155 = vmatprep.subr.bf16.mxu1 %v1154_v47  ;;  %v559_v47 = vld [vmem:[#allocation13 + $0xd0] sm:$0xff]  ;;  %v1192_v49 = vpack.c.bf16 %v542_v46, %v541_v45 }
 0x187   :  { %v1194_v50 = vpack.c.bf16 %v560_v48, %v559_v47  ;;  %v737_v46 = vld [vmem:[%s1941_s13] sm:$0xff]  ;;  %v738_v47 = vld [vmem:[%s1941_s13 + $0x8] sm:$0xff]  ;;  %v739_v48 = vld [vmem:[%s1941_s13 + $0x10] sm:$0xff] }
 0x189   :  { %1157 = vmatpush1.bf16.msra.mxu1 %v1156_v52  ;;  %v544_v52 = vld [vmem:[#allocation13 + $0x58] sm:$0xff] }
 0x18a   :  { %1159 = vmatprep.subr.bf16.mxu1 %v1158_v53  ;;  %v561_v53 = vld [vmem:[#allocation13 + $0xe0] sm:$0xff]  ;;  %v1196_v55 = vpack.c.bf16 %v544_v52, %v543_v51  ;;  %v741_v52 = vld [vmem:[%s1941_s13 + $0x20] sm:$0xff] }
 0x18b   :  { %v1198_v56 = vpack.c.bf16 %v562_v54, %v561_v53  ;;  %v742_v53 = vld [vmem:[%s1941_s13 + $0x28] sm:$0xff] }
 0x18c   :  { %v1237_v54 = vpack.c.bf16 %v742_v53, %v741_v52 }
 0x18d   :  { %1161 = vmatpush1.bf16.msra.mxu1 %v1160_v58 }
 0x18e   :  { %1163 = vmatprep.subr.bf16.mxu1 %v1162_v59 }
 0x191   :  { %1165 = vmatpush1.bf16.msra.mxu1 %v1164_v2  ;;  %v1200_v2 = vpack.c.bf16 %v546_v63, %v545_v62  ;;  %v744_v62 = vld [vmem:[%s1941_s13 + $0x38] sm:$0xff] }
 0x192   :  { %1167 = vmatprep.subr.bf16.mxu1 %v1166_v3  ;;  %v563_v3 = vld [vmem:[#allocation13 + $0xf0] sm:$0xff] }
 0x193   :  { %v1202_v5 = vpack.c.bf16 %v564_v4, %v563_v3  ;;  %v826_v3 = vld [vmem:[%s1943_s15] sm:$0xff]  ;;  %v827_v4 = vld [vmem:[%s1943_s15 + $0x8] sm:$0xff] }
 0x195   :  { %1169 = vmatpush1.bf16.msra.mxu1 %v1168_v6  ;;  %v547_v6 = vld [vmem:[#allocation13 + $0x70] sm:$0xff] }
 0x196   :  { %1171 = vmatprep.subr.bf16.mxu1 %v1170_v14 }
 0x199   :  { %1173 = vmatpush1.bf16.msra.mxu1 %v1172_v17  ;;  %v1213_v17 = vpack.c.bf16 %v648_v16, %v647_v15 }
 0x19a   :  { %1206 = vmatprep.subr.bf16.mxu1 %v1484_v1 }
 0x24f   :  { %v321_v8 = vpop.f32.mrb[0].mxu1 }
 0x250   :  { %v322_v9 = vadd.f32 %v932_v7, %v321_v8  ;;  %v1039_v10 = vpop.f32.mrb[1].mxu1  ;;  %v548_v7 = vld [vmem:[#allocation13 + $0x78] sm:$0xff] }
 0x251   :  { %v1204_v8 = vpack.c.bf16 %v548_v7, %v547_v6  ;;  %v644_v10 = vld [vmem:[%s1939_s11 + $0x8] sm:$0xff] }
 0x252   :  { %v325_v11 = vmax.f32 %v322_v9, 0.0  ;;  %v643_v9 = vld [vmem:[%s1939_s11] sm:$0xff] }
 0x253   :  { %v1207_v12 = vpack.c.bf16 %v644_v10, %v643_v9  ;;  %v828_v10 = vld [vmem:[%s1943_s15 + $0x10] sm:$0xff] }
 0x254   :  { %1057 = vmatmul.mubr.msk.f32.vlgmr.msra.gmra.mrb[2].mxu0 %vm341_vm3, %v325_v11  ;;  %v645_v11 = vld [vmem:[%s1939_s11 + $0x10] sm:$0xff] }
 0x255   :  { %1177 = vmatpush3.bf16.msra.mxu0 %v1176_v25  ;;  %v1210_v14 = vpack.c.bf16 %v646_v13, %v645_v11  ;;  %v654_v25 = vld [vmem:[%s1939_s11 + $0x58] sm:$0xff]  ;;  %v938_v13 = vld [vmem:[%s1942_s14] ss:$0 sm:$0xff] }
 0x256   :  { %1179 = vmatprep.subr.bf16.mxu0 %v1178_v26  ;;  %v1222_v26 = vpack.c.bf16 %v654_v25, %v653_v24  ;;  %v829_v11 = vld [vmem:[%s1943_s15 + $0x18] sm:$0xff]  ;;  %s1438_s15 = scalar_lea.vmem %s918_s5, 128 }
 0x257   :  { %p1439_p8 = scmp.ne.s32.totalorder %s918_s5, %s1438_s15  ;;  %p1444_p10 = scmp.lt.s32.totalorder %s1438_s15, %s1438_s15 }
 0x259   :  { %1181 = vmatpush3.bf16.msra.mxu0 %v1180_v31  ;;  %v456_v31 = vsub.s32 1, %v451_v28  ;;  %p1445_p11 = por %p1444_p10, %p1443_p9 }
 0x25a   :  { %1183 = vmatprep.subr.bf16.mxu0 %v1182_v32  ;;  %v453_v32 = vrot.slane %v448_v30, %v452_v29 }
 0x25b   :  { %v457_v33 = vrot.slane %v448_v30, %v456_v31  ;;  %p1446_p12 = pnand %p1445_p11, %p1439_p8 }
 0x25d   :  { %1185 = vmatpush3.bf16.msra.mxu0 %v1184_v37 }
 0x25e   :  { %1187 = vmatprep.subr.bf16.mxu0 %v1186_v38 }
 0x261   :  { %1189 = vmatpush3.bf16.msra.mxu0 %v1188_v43  ;;  %v657_v43 = vld [vmem:[%s1939_s11 + $0x70] sm:$0xff] }
 0x262   :  { %1191 = vmatprep.subr.bf16.mxu0 %v1190_v44  ;;  %v658_v44 = vld [vmem:[%s1939_s11 + $0x78] sm:$0xff] }
 0x263   :  { %v1228_v45 = vpack.c.bf16 %v658_v44, %v657_v43 }
 0x265   :  { %1193 = vmatpush3.bf16.msra.mxu0 %v1192_v49  ;;  %v1231_v49 = vpack.c.bf16 %v738_v47, %v737_v46 }
 0x266   :  { %1195 = vmatprep.subr.bf16.mxu0 %v1194_v50  ;;  %v740_v50 = vld [vmem:[%s1941_s13 + $0x18] sm:$0xff] }
 0x267   :  { %v1234_v51 = vpack.c.bf16 %v740_v50, %v739_v48 }
 0x269   :  { %1197 = vmatpush3.bf16.msra.mxu0 %v1196_v55 }
 0x26a   :  { %1199 = vmatprep.subr.bf16.mxu0 %v1198_v56  ;;  %v936_v56 = vld [vmem:[#allocation14] ss:$0 sm:$0xff] }
 0x26d   :  { %1201 = vmatpush3.bf16.msra.mxu0 %v1200_v2  ;;  %v937_v2 = vld [vmem:[%s1940_s12] ss:$0 sm:$0xff] }
 0x26e   :  { %1203 = vmatprep.subr.bf16.mxu0 %v1202_v5 }
 0x271   :  { %1205 = vmatpush3.bf16.msra.mxu0 %v1204_v8  ;;  %v1243_v8 = vpack.c.bf16 %v827_v4, %v826_v3 }
 0x272   :  { %1230 = vmatprep.subr.bf16.mxu0 %v1484_v1 }
 0x327   :  { %v411_v58 = vpop.f32.mrb[2].mxu0 }
 0x328   :  { %v412_v59 = vadd.f32 %v934_v57, %v411_v58  ;;  %v1058_v60 = vpop.f32.mrb[3].mxu0 }
 0x32a   :  { %v415_v61 = vmax.f32 %v412_v59, 0.0 }
 0x32c   :  { %525 = vmatmul.mubr.f32.vlgmr.msra.gmra.mrb[2].mxu1 %v415_v61  ;;  %v743_v61 = vld [vmem:[%s1941_s13 + $0x30] sm:$0xff] }
 0x32d   :  { %1091 = vmatprep.mubr.msk.f32.mxu1 %vm1483_vm0, %v1482_v0  ;;  %1208 = vmatpush3.bf16.msra.mxu1 %v1207_v12  ;;  %v1240_v63 = vpack.c.bf16 %v744_v62, %v743_v61  ;;  %v1246_v12 = vpack.c.bf16 %v829_v11, %v828_v10 }
 0x32e   :  { %1209 = vmatprep.subr.bf16.mxu1 %v1484_v1 }
 0x331   :  { %1211 = vmatpush3.bf16.msra.mxu1 %v1210_v14 }
 0x332   :  { %1212 = vmatprep.subr.bf16.mxu1 %v1484_v1 }
 0x335   :  { %1214 = vmatpush3.bf16.msra.mxu1 %v1213_v17 }
 0x336   :  { %1215 = vmatprep.subr.bf16.mxu1 %v1484_v1 }
 0x339   :  { %1217 = vmatpush3.bf16.msra.mxu1 %v1216_v20 }
 0x33a   :  { %1218 = vmatprep.subr.bf16.mxu1 %v1484_v1 }
 0x33d   :  { %1220 = vmatpush3.bf16.msra.mxu1 %v1219_v23 }
 0x33e   :  { %1221 = vmatprep.subr.bf16.mxu1 %v1484_v1 }
 0x341   :  { %1223 = vmatpush3.bf16.msra.mxu1 %v1222_v26 }
 0x342   :  { %1224 = vmatprep.subr.bf16.mxu1 %v1484_v1 }
 0x345   :  { %1226 = vmatpush3.bf16.msra.mxu1 %v1225_v42 }
 0x346   :  { %1227 = vmatprep.subr.bf16.mxu1 %v1484_v1 }
 0x349   :  { %1229 = vmatpush3.bf16.msra.mxu1 %v1228_v45 }
 0x3ff   :  { %v526_v34 = vpop.f32.mrb[2].mxu1 }
 0x400   :  { %v527_v35 = vadd.f32 %v526_v34, %v453_v32  ;;  %v528_v36 = vpop.f32.mrb[3].mxu1 }
 0x401   :  { %v529_v37 = vadd.f32 %v528_v36, %v457_v33 }
 0x402   :  { %v531_v39 = vmax.f32 %v527_v35, 0.0 }
 0x403   :  { %v532_v38 = vmax.f32 %v529_v37, 0.0 }
 0x405   :  { %636 = vmatprep.mubr.f32.mxu0 %v532_v38 }
 0x406   :  { %637 = vmatmul.mubr.f32.vlgmr.msra.gmra.mrb[4].mxu0 %v531_v39 }
 0x407   :  { %1110 = vmatprep.mubr.msk.f32.mxu0 %vm1483_vm0, %v1482_v0  ;;  %1232 = vmatpush3.bf16.msra.mxu0 %v1231_v49 }
 0x408   :  { %1233 = vmatprep.subr.bf16.mxu0 %v1484_v1 }
 0x40b   :  { %1235 = vmatpush3.bf16.msra.mxu0 %v1234_v51 }
 0x40c   :  { %1236 = vmatprep.subr.bf16.mxu0 %v1484_v1 }
 0x40f   :  { %1238 = vmatpush3.bf16.msra.mxu0 %v1237_v54 }
 0x410   :  { %1239 = vmatprep.subr.bf16.mxu0 %v1484_v1 }
 0x413   :  { %1241 = vmatpush3.bf16.msra.mxu0 %v1240_v63 }
 0x414   :  { %1242 = vmatprep.subr.bf16.mxu0 %v1484_v1 }
 0x4d9   :  { %v990_v55 = vpop.f32.mrb[4].mxu0 }
 0x4da   :  { %v991_v57 = vpop.f32.mrb[5].mxu0 }
 0x4db   :  { %v992_v58 = vadd.f32 %v991_v57, %v990_v55 }
 0x4dd   :  { %v639_v59 = vadd.f32 %v992_v58, %v936_v56 }
 0x4df   :  { %v642_v60 = vmax.f32 %v639_v59, 0.0 }
 0x4e1   :  { %1092 = vmatmul.mubr.f32.vlgmr.msra.gmra.mrb[4].mxu1 %v642_v60 }
 0x5b4   :  { %v732_v5 = vpop.f32.mrb[4].mxu1 }
 0x5b5   :  { %v733_v6 = vadd.f32 %v937_v2, %v732_v5  ;;  %v1093_v7 = vpop.f32.mrb[5].mxu1 }
 0x5b7   :  { %v736_v9 = vmax.f32 %v733_v6, 0.0 }
 0x5b9   :  { %1111 = vmatmul.mubr.msk.f32.vlgmr.msra.gmra.mrb[6].mxu0 %vm341_vm3, %v736_v9 }
 0x5ba   :  { %1244 = vmatpush3.bf16.msra.mxu0 %v1243_v8  ;;  %1121 = vmatprep.mubr.msk.f32.mxu0 %vm1483_vm0, %v1482_v0 }
 0x5bb   :  { %1245 = vmatprep.subr.bf16.mxu0 %v1484_v1  ;;  %v940_v1 = vld [vmem:[%s1944_s16] ss:$0 sm:$0xff] }
 0x5be   :  { %1247 = vmatpush3.bf16.msra.mxu0 %v1246_v12 }
 0x68c   :  { %v821_v14 = vpop.f32.mrb[6].mxu0 }
 0x68d   :  { %v822_v15 = vadd.f32 %v938_v13, %v821_v14  ;;  %v1112_v16 = vpop.f32.mrb[7].mxu0 }
 0x68f   :  { %v825_v0 = vmax.f32 %v822_v15, 0.0 }
 0x691   :  { %1122 = vmatmul.mubr.msk.f32.vlgmr.msra.gmra.mrb[8].mxu0 %vm251_vm2, %v825_v0 }
 0x764   :  { %v906_v17 = vpop.f32.mrb[8].mxu0 }
 0x765   :  { %v907_v18 = vadd.f32 %v940_v1, %v906_v17  ;;  %v1123_v19 = vpop.f32.mrb[9].mxu0 }
 0x767   :  { %910 = vst.msk [vmem:[#allocation16] sm:$0xff] %vm165_vm1, %v907_v18 }
 0x768   :  { %1449 = shalt.err (!%p1446_p12)
}
 0x769   :  { %s1953_s6 = sld [smem:[#allocation25_spill]] }
 0x76f   :  { %s1450_s2 = scalar_lea.hbm %s1953_s6, 128 }
 0x770   :  { %p1451_p13 = scmp.ne.s32.totalorder %s1953_s6, %s1450_s2  ;;  %p1454_p0 = scmp.lt.u32.totalorder %s1450_s2, %s1953_s6 }
 0x772   :  { %p1456_p1 = pnand %p1454_p0, %p1451_p13 }
 0x774   :  { %1459 = shalt.err (!%p1456_p1)
}
 0x775   :  { %920 = dma.vmem_to_hbm [thread:$0]  %s918_s5, 128, %s1953_s6, [#allocation4]  }
 0x776   :  { %1470 = dma.done.wait [#allocation4], 128  }
 0x777   :  { %1471 = vsyncadd [#allocation4], 4294967168 }
 0x778   :  { %924 = vsyncpa [#allocation3], 1 }
 0x779   :  { %925 = vsyncpa [#allocation6], 1 }
 0x77a   :  { %926 = vsyncpa [#allocation9], 1 }
 0x77b   :  { %927 = vsyncpa [#allocation12], 1 }
 0x77c   :  { %928 = vsyncpa [#allocation15], 1 }
 0x77d   :  { %929 = vsyncpa [#allocation4], 1 }

</bundles_post_ra>
